<compile_context>
chip_gen: v6e
topology: v6e:2x2x1
jax: 0.10.0
libtpu: 0.0.40
codegen_flags: <defaults>
</compile_context>

<pallas_src>
import functools
import math

import jax
import jax.numpy as jnp
from jax.experimental import pallas as pl
from jax.experimental.pallas import tpu as pltpu


# ----------------------------------------------------------------------------
# Config (mirrors the fields the PyTorch module reads)
# ----------------------------------------------------------------------------
class Config:
    vocab_size = 32
    r_min = 0.5
    r_max = 1.0


# ----------------------------------------------------------------------------
# Parameter init (deterministic, same math as the torch __init__)
# ----------------------------------------------------------------------------
def init_embedding_table(config, key):
    thetas = jax.random.uniform(key, (config.vocab_size,), dtype=jnp.float32) * (
        2.0 * math.pi
    )
    vocab_positions = jnp.arange(config.vocab_size, dtype=jnp.float32)
    normalized_positions = vocab_positions / config.vocab_size
    radii = config.r_min + (config.r_max - config.r_min) * (1.0 - normalized_positions)
    table = jnp.stack(
        [radii * jnp.cos(thetas), radii * jnp.sin(thetas)], axis=-1
    )  # (V, 2) float32
    return table


# ----------------------------------------------------------------------------
# Pallas kernel: lane-dense embedding gather via transposed one-hot matmul
# ----------------------------------------------------------------------------
def _make_embed_kernel(compute_dtype):
    def kernel(ids_ref, vocab_ref, table_t_ref, out_ref):
        # ids_ref:     (1, TILE_N)  int32   -- tokens on lanes
        # vocab_ref:   (V, 1)       int32   -- vocab ids on sublanes, VMEM-resident
        # table_t_ref: (2, V)       float32 -- transposed table, VMEM-resident
        # out_ref:     (2, TILE_N)  float32 -- planar, lane-dense store
        #
        # One-hot transposed (V on sublanes, tokens on lanes).  Out-of-range /
        # negative ids produce an all-zero column -> zero embedding.
        # TODO(synk): out-of-range token ids silently map to a zero embedding
        # (nn.Embedding would error / return garbage instead).
        one_hot_t = (ids_ref[...] == vocab_ref[...]).astype(compute_dtype)  # (V, TILE_N)

        # (2, V) @ (V, TILE_N) -> (2, TILE_N); exact in f32 since each valid
        # column carries a single exactly-representable 1.0.
        out_ref[...] = jnp.dot(
            table_t_ref[...].astype(compute_dtype),
            one_hot_t,
            preferred_element_type=jnp.float32,
        )

    return kernel


@functools.partial(
    jax.jit, static_argnames=("tile_n", "interleaved", "use_bf16_onehot")
)
def quantum_token_representation(
    token_ids, table, *, tile_n=32768, interleaved=True, use_bf16_onehot=False
):
    """Embedding lookup: token_ids (any int shape), table (V, 2) float32.

    interleaved=True  -> returns token_ids.shape + (2,)  (module semantics).
    interleaved=False -> returns (2,) + token_ids.shape  (planar; lets the
                         consumer fuse away the lane-sparse (N, 2) transpose).
    use_bf16_onehot   -> opt-in bf16 one-hot/table on the MXU (~1e-3 rel error).
    """
    orig_shape = token_ids.shape
    ids_row = token_ids.reshape(1, -1).astype(jnp.int32)  # (1, N): no pad / no copy
    n = ids_row.shape[1]
    v = table.shape[0]

    if n == 0:  # guard the zero-size-grid edge case
        out = jnp.zeros((2, 0), jnp.float32)
        if interleaved:
            return out.T.reshape(*orig_shape, 2)
        return out.reshape(2, *orig_shape)

    # Static tile: multiple of 128 lanes, capped at tile_n (default 32K).
    tile = max(128, min(tile_n, pl.cdiv(n, 128) * 128))
    tile = (tile // 128) * 128
    num_tiles = pl.cdiv(n, tile)  # ragged tail handled by Pallas block masking

    compute_dtype = jnp.bfloat16 if use_bf16_onehot else jnp.float32
    table_t = table.astype(jnp.float32).T                      # (2, V) planar table
    vocab_col = jnp.arange(v, dtype=jnp.int32).reshape(v, 1)   # hoisted "iota"

    cost = pl.CostEstimate(
        flops=2 * 2 * v * num_tiles * tile,
        transcendentals=0,
        bytes_accessed=4 * n + 8 * n + 8 * v + 4 * v,
    )

    out_planar = pl.pallas_call(
        _make_embed_kernel(compute_dtype),
        out_shape=jax.ShapeDtypeStruct((2, n), jnp.float32),
        grid=(num_tiles,),
        in_specs=[
            pl.BlockSpec((1, tile), lambda i: (0, i)),   # ids stream, lane-dense
            pl.BlockSpec((v, 1), lambda i: (0, 0)),      # VMEM-resident vocab col
            pl.BlockSpec((2, v), lambda i: (0, 0)),      # VMEM-resident table
        ],
        out_specs=pl.BlockSpec((2, tile), lambda i: (0, i)),
        compiler_params=pltpu.CompilerParams(
            dimension_semantics=("parallel",),
        ),
        cost_estimate=cost,
    )(ids_row, vocab_col, table_t)

    if not interleaved:
        return out_planar.reshape(2, *orig_shape)
    # Module-contract interleaved layout; prefer interleaved=False for large N
    # so the consumer can fuse this lane-sparse transpose.
    return out_planar.T.reshape(*orig_shape, 2)


# ----------------------------------------------------------------------------
# Demo / check
# ----------------------------------------------------------------------------
if __name__ == "__main__":
    config = Config()
    key = jax.random.PRNGKey(0)
    k_table, k_ids = jax.random.split(key)

    table = init_embedding_table(config, k_table)  # (V, 2)

    batch, seq = 2, 8
    token_ids = jax.random.randint(
        k_ids, (batch, seq), 0, config.vocab_size, dtype=jnp.int32
    )

    out = jax.block_until_ready(quantum_token_representation(token_ids, table))

    # Reference: plain JAX embedding lookup (same semantics as nn.Embedding).
    ref = jnp.take(table, token_ids, axis=0)
    assert out.shape == (batch, seq, 2)
    assert out.dtype == jnp.float32
    assert jnp.allclose(out, ref, atol=1e-6), "mismatch vs reference gather"

    # Multi-tile, ragged (non-multiple-of-128) N: exercises the masked last block.
    big_ids = jax.random.randint(
        jax.random.PRNGKey(1), (3, 3001), 0, config.vocab_size, dtype=jnp.int32
    )
    big_out = jax.block_until_ready(
        quantum_token_representation(big_ids, table, tile_n=4096)
    )
    big_ref = jnp.take(table, big_ids, axis=0)
    assert big_out.shape == (3, 3001, 2)
    assert jnp.allclose(big_out, big_ref, atol=1e-6), "mismatch on multi-tile case"

    # Planar layout path (no wrapper-side (N, 2) transpose).
    planar = jax.block_until_ready(
        quantum_token_representation(token_ids, table, interleaved=False)
    )
    assert planar.shape == (2, batch, seq)
    assert jnp.allclose(jnp.moveaxis(planar, 0, -1), ref, atol=1e-6)

    print("KERNEL_OK")
</pallas_src>

<mosaic_0001>
module attributes {stable_mosaic.version = 11 : i64} {
  func.func @kernel(%arg0: i32, %arg1: memref<1x128xi32, #tpu.memory_space<vmem>>, %arg2: memref<32x1xi32, #tpu.memory_space<vmem>>, %arg3: memref<2x32xf32, #tpu.memory_space<vmem>>, %arg4: memref<2x128xf32, #tpu.memory_space<vmem>>) attributes {dimension_semantics = [#tpu.dimension_semantics<parallel>], iteration_bounds = array<i64: 1>, scalar_prefetch = 0 : i64, scratch_operands = 0 : i64, tpu.core_type = #tpu.core_type<tc>, window_params = [{transform_indices = @transform_0, window_bounds = array<i64: 1, 128>}, {pipeline_mode = #tpu.pipeline_mode<synchronous>, transform_indices = @transform_1, window_bounds = array<i64: 32, 1>}, {pipeline_mode = #tpu.pipeline_mode<synchronous>, transform_indices = @transform_2, window_bounds = array<i64: 2, 32>}, {transform_indices = @transform_3, window_bounds = array<i64: 2, 128>}]} {
    %c0 = arith.constant 0 : index
    %c0_0 = arith.constant 0 : index
    %0 = vector.load %arg1[%c0, %c0_0] : memref<1x128xi32, #tpu.memory_space<vmem>>, vector<1x128xi32>
    %c0_1 = arith.constant 0 : index
    %c0_2 = arith.constant 0 : index
    %1 = vector.load %arg2[%c0_1, %c0_2] : memref<32x1xi32, #tpu.memory_space<vmem>>, vector<32x1xi32>
    %2 = vector.broadcast %0 : vector<1x128xi32> to vector<32x128xi32>
    %3 = vector.broadcast %1 : vector<32x1xi32> to vector<32x128xi32>
    %4 = arith.cmpi eq, %2, %3 : vector<32x128xi32>
    %5 = arith.extui %4 : vector<32x128xi1> to vector<32x128xi32>
    %6 = arith.sitofp %5 : vector<32x128xi32> to vector<32x128xf32>
    %c0_3 = arith.constant 0 : index
    %c0_4 = arith.constant 0 : index
    %7 = vector.load %arg3[%c0_3, %c0_4] : memref<2x32xf32, #tpu.memory_space<vmem>>, vector<2x32xf32>
    %cst = arith.constant dense<0.000000e+00> : vector<2x128xf32>
    %8 = tpu.matmul %7, %6, %cst {dimension_numbers = #tpu.dot_dimension_numbers<[1], [0], [0], [1], [0, 0, 1, 1], [], []>} : vector<2x32xf32>, vector<32x128xf32>, vector<2x128xf32> -> vector<2x128xf32>
    %c0_5 = arith.constant 0 : index
    %c0_6 = arith.constant 0 : index
    %9 = vector.load %arg4[%c0_5, %c0_6] : memref<2x128xf32, #tpu.memory_space<vmem>>, vector<2x128xf32>
    tpu.vector_store %arg4[%c0_5, %c0_6], %8 {strides = array<i32>} : memref<2x128xf32, #tpu.memory_space<vmem>>, vector<2x128xf32>,
    return
  }
  func.func @transform_0(%arg0: i32) -> (i32, i32) {
    %c0_i32 = arith.constant 0 : i32
    %c0_i32_0 = arith.constant 0 : i32
    return %c0_i32, %arg0 : i32, i32
  }
  func.func @transform_1(%arg0: i32) -> (i32, i32) {
    %c0_i32 = arith.constant 0 : i32
    %c0_i32_0 = arith.constant 0 : i32
    %c0_i32_1 = arith.constant 0 : i32
    return %c0_i32, %c0_i32_0 : i32, i32
  }
  func.func @transform_2(%arg0: i32) -> (i32, i32) {
    %c0_i32 = arith.constant 0 : i32
    %c0_i32_0 = arith.constant 0 : i32
    %c0_i32_1 = arith.constant 0 : i32
    return %c0_i32, %c0_i32_0 : i32, i32
  }
  func.func @transform_3(%arg0: i32) -> (i32, i32) {
    %c0_i32 = arith.constant 0 : i32
    %c0_i32_0 = arith.constant 0 : i32
    return %c0_i32, %arg0 : i32, i32
  }
}

</mosaic_0001>

<bundles_post_ra>
// kernel: quantum_token_representation.1
= control target key start
LH: loop header
LB: loop body
LE: loop exit
PB: predicated region body
PF: predicated region fallthrough
CT: control target
= control target key end

     0   :  { %v159_v0 = vmov 0   ;;  %v160_v5 = vmov 0.0   ;;  %vm161_vm0 = vmmov 0   ;;  %v162_v9 = vmov 1.0   ;;  %s204_s1 = inlined_call_operand.vmem [shape: s32[32,1], index: 1, kind: input, shape index: {}]   ;;  %s205_s0 = inlined_call_operand.vmem [shape: s32[1,16], index: 0, kind: input, shape index: {}]   ;;  %s206_s2 = inlined_call_operand.vmem [shape: f32[2,32], index: 2, kind: input, shape index: {}]   ;;  %s207_s3 = inlined_call_operand.vmem [shape: f32[2,16], index: 3, kind: output, shape index: {}]  }
   0x1   :  { %158 = vset.pattern.permute.xlu1 %v159_v0  ;;  %157 = vset.pattern.permute.xlu0 %v159_v0  ;;  %v18_v1 = vld [vmem:[%s204_s1 + $0x18] sm:$0xff]  ;;  %v16_v2 = vld [vmem:[%s204_s1 + $0x8] sm:$0xff]  ;;  %v17_v3 = vld [vmem:[%s204_s1 + $0x10] sm:$0xff]  ;;  %vm48_vm4 = vcmask 261120  }
   0x2   :  { %33 = vperm.xlu0 %157, %v18_v1   ;;  %27 = vperm.xlu1 %158, %v16_v2   ;;  %v15_v4 = vld [vmem:[%s204_s1] sm:$0xff] }
   0x3   :  { %142 = vmatprep.subr.mxu0 %v160_v5  ;;  %150 = vmatprep.mubr.msk.f32.mxu0 %vm161_vm0, %v160_v5  ;;  %v127_v6 = vld [vmem:[%s205_s0] ss:$0 sm:$0xff] }
   0x4   :  { %v47_v12 = vld [vmem:[%s206_s2] sm:$0x3] }
   0x6   :  { %30 = vperm.xlu0 %157, %v17_v3   ;;  %24 = vperm.xlu1 %158, %v15_v4  }
  0x7d   :  { %v34_v7 = vpop.permute.xlu0 %33  ;;  %v28_v8 = vpop.permute.xlu1 %27 }
  0x7e   :  { %vm38_vm1 = vcmp.eq.s32.totalorder %v127_v6, %v34_v7  ;;  %vm36_vm3 = vcmp.eq.s32.totalorder %v127_v6, %v28_v8 }
  0x7f   :  { %143 = vmatpush3.msk.msra.mxu0 %vm38_vm1, %v162_v9 }
  0x80   :  { %144 = vmatprep.subr.mxu0 %v160_v5 }
  0x81   :  { %v31_v10 = vpop.permute.xlu0 %30  ;;  %v25_v11 = vpop.permute.xlu1 %24 }
  0x82   :  { %vm37_vm2 = vcmp.eq.s32.totalorder %v127_v6, %v31_v10  ;;  %vm35_vm5 = vcmp.eq.s32.totalorder %v127_v6, %v25_v11 }
  0x83   :  { %145 = vmatpush3.msk.msra.mxu0 %vm37_vm2, %v162_v9 }
  0x84   :  { %146 = vmatprep.subr.mxu0 %v160_v5 }
  0x85   :  { %147 = vmatpush3.msk.msra.mxu0 %vm36_vm3, %v162_v9 }
  0x86   :  { %148 = vmatprep.subr.mxu0 %v160_v5 }
  0x87   :  { %149 = vmatpush3.msk.msra.mxu0 %vm35_vm5, %v162_v9 }
  0x88   :  { %151 = vmatmul.mubr.msk.f32.vlgmr.msra.gmra.mxu0 %vm48_vm4, %v47_v12 }
 0x148   :  { %v118_v13 = vpop.f32.mrf.mxu0 }
 0x149   :  { %122 = vst [vmem:[%s207_s3] sm:$0x3] %v118_v13 }
 0x14a   :  { %v152_v14 = vpop.f32.mrf.mxu0 }

</bundles_post_ra>
